<compile_context>
chip_gen: v5e
topology: v5e:2x2
jax: 0.10.0
libtpu: 0.0.40
codegen_flags: <defaults>
</compile_context>

<pallas_src>
import jax
import jax.numpy as jnp
from jax.experimental import pallas as pl
from jax.experimental.pallas import tpu as pltpu

EPS = 1e-5                      # nn.BatchNorm2d default eps
MXU_DTYPE = jnp.bfloat16        # set to jnp.float32 as a numerics-debug knob


def up_conv_kernel(xp_ref, m_ref, ss_ref, out_ref):
    # xp_ref : (1, H+1, 2*W*Cin)   bf16  adjacent-row (im2row) packed input;
    #                                    row r = concat(x_pad[r], x_pad[r+1])
    # m_ref  : (1, 2*W*Cin, OW*Cout) bf16 Toeplitz weights for this row phase
    # ss_ref : (2, OW*Cout)        f32  row0 = fused BN scale, row1 = fused shift
    # out_ref: (1, 1, H, OW*Cout)  f32  lane-dense output rows of this phase
    oh = out_ref.shape[2]
    odd = pl.program_id(1) == 1

    # Ref-level row-window loads at static offsets; the phase only shifts the
    # H-row window by one padded row, selected with a cheap VPU select.
    lhs_even = xp_ref[0, pl.ds(0, oh), :]
    lhs_odd = xp_ref[0, pl.ds(1, oh), :]
    lhs = jnp.where(odd, lhs_odd, lhs_even)

    # One MXU matmul per grid step: (H, 2*W*Cin) @ (2*W*Cin, OW*Cout), f32 acc.
    acc = jnp.dot(lhs, m_ref[0], preferred_element_type=jnp.float32)

    # Fused epilogue: conv bias + BatchNorm(inference) + ReLU == scale/shift/max.
    scale = ss_ref[pl.ds(0, 1), :]
    shift = ss_ref[pl.ds(1, 1), :]
    out_ref[0, 0] = jnp.maximum(acc * scale + shift, 0.0).astype(out_ref.dtype)


def _build_toeplitz(w, W):
    """Fold {2x nearest upsample, 3x3 taps, Cin} into two row-phase Toeplitz mats.

    Returns M of shape (2, 2*W*Cin, 2*W*Cout) such that, with x_pad the
    (H+2, W*Cin) lane-packed input (one zero halo row top/bottom) and
    lhs2[r] = concat(x_pad[r], x_pad[r+1]):
        conv_out_row[2*i + p] = lhs2[i + p] @ M[p]      (lane-packed over OW*Cout)
    """
    Cout, Cin, _, _ = w.shape
    OW = 2 * W
    wt = jnp.transpose(w, (2, 3, 1, 0)).astype(jnp.float32)          # (ky, kx, Cin, Cout)

    # Row fold: output row 2i+p reads original rows via its two row-window taps j:
    #   p=0 (even): j=0 <- ky=0          j=1 <- ky in {1,2}
    #   p=1 (odd):  j=0 <- ky in {0,1}   j=1 <- ky=2
    rsel = jnp.array([[[1., 0., 0.], [0., 1., 1.]],
                      [[1., 1., 0.], [0., 0., 1.]]], jnp.float32)     # (p, j, ky)
    wr = jnp.einsum('pjy,yxiu->pjxiu', rsel, wt)                      # (p, j, kx, Cin, Cout)

    # Column fold (width upsample + conv zero padding): output column ox reads
    # original column c through tap kx iff 1 <= ox+kx <= 2W and (ox+kx-1)//2 == c.
    ox = jnp.arange(OW)[:, None, None]
    c = jnp.arange(W)[None, :, None]
    kx = jnp.arange(3)[None, None, :]
    up = ox + kx
    hit = ((up >= 1) & (up <= OW) & ((up - 1) // 2 == c)).astype(jnp.float32)  # (OW, W, 3)

    m6 = jnp.einsum('ocx,pjxiu->pjciou', hit, wr)     # (p, j, c, Cin, ox, Cout)
    # TODO(synk): at production shapes build one width-tile's block instead of the
    #             full (p, j, W, Cin, OW, Cout) intermediate (shift invariance).
    return m6.reshape(2, 2 * W * Cin, OW * Cout)


@jax.jit
def up_conv(x_nchw, w, b, gamma, beta, running_mean, running_var):
    """PyTorch-equivalent forward of `up_conv` (BatchNorm in inference mode).

    x_nchw: (N, Cin, H, W); w: (Cout, Cin, 3, 3) OIHW; b/gamma/beta/running_*: (Cout,).
    Returns (N, Cout, 2H, 2W) float32.
    """
    N, Cin, H, W = x_nchw.shape
    Cout = w.shape[0]
    OH, OW = 2 * H, 2 * W
    K0 = W * Cin                 # packed width of one original row
    K = 2 * K0                   # matmul contraction (two adjacent rows, im2row)
    OWC = OW * Cout              # lane-packed output width (multiple of 128 here)

    # --- activations: NCHW -> (N, H, W*Cin); 1-row zero halo; adjacent-row pack ---
    # No 2x-upsampled intermediate and no pad columns are ever written to HBM.
    x = jnp.transpose(x_nchw, (0, 2, 3, 1)).astype(jnp.float32)      # (N, H, W, Cin)
    xp = jnp.pad(x.reshape(N, H, K0), ((0, 0), (1, 1), (0, 0)))      # (N, H+2, K0)
    xp2 = jnp.concatenate([xp[:, :-1, :], xp[:, 1:, :]], axis=-1)    # (N, H+1, K)
    xp2 = xp2.astype(MXU_DTYPE)

    # --- upsample + 3x3 taps + Cin folded into per-row-phase Toeplitz weights ---
    m = _build_toeplitz(w, W).astype(MXU_DTYPE)                      # (2, K, OWC)

    # --- fused conv-bias + BatchNorm(inference) scale/shift, lane-packed --------
    scale_c = gamma.astype(jnp.float32) * jax.lax.rsqrt(
        running_var.astype(jnp.float32) + EPS)
    shift_c = (b.astype(jnp.float32) - running_mean.astype(jnp.float32)) * scale_c \
        + beta.astype(jnp.float32)
    ss = jnp.stack([jnp.tile(scale_c, OW), jnp.tile(shift_c, OW)])   # (2, OWC) f32

    bpe = jnp.dtype(MXU_DTYPE).itemsize
    cost = pl.CostEstimate(
        flops=2 * N * 2 * H * K * OWC,
        transcendentals=0,
        bytes_accessed=(N * (H + 1) * K * bpe            # xp2 (fetched once per image)
                        + N * 2 * K * OWC * bpe          # M (re-fetched per phase step)
                        + 2 * OWC * 4                    # scale/shift
                        + N * 2 * H * OWC * 4))          # output

    out_lp = pl.pallas_call(
        up_conv_kernel,
        out_shape=jax.ShapeDtypeStruct((N, 2, H, OWC), jnp.float32),
        grid_spec=pltpu.PrefetchScalarGridSpec(
            num_scalar_prefetch=0,
            grid=(N, 2),                                 # (batch, output-row phase)
            in_specs=[
                pl.BlockSpec((1, H + 1, K), lambda n, p: (n, 0, 0)),
                pl.BlockSpec((1, K, OWC), lambda n, p: (p, 0, 0)),
                pl.BlockSpec((2, OWC), lambda n, p: (0, 0)),
            ],
            out_specs=pl.BlockSpec((1, 1, H, OWC), lambda n, p: (n, p, 0, 0)),
        ),
        compiler_params=pltpu.CompilerParams(
            dimension_semantics=("parallel", "arbitrary")),
        cost_estimate=cost,
    )(xp2, m, ss)

    # (N, phase, H, OW*Cout) -> interleave even/odd output rows -> NCHW.
    out = out_lp.reshape(N, 2, H, OW, Cout).transpose(0, 2, 1, 3, 4)
    out = out.reshape(N, OH, OW, Cout)
    return jnp.transpose(out, (0, 3, 1, 2))


def reference(x, w, b, gamma, beta, running_mean, running_var):
    """Pure-JAX reference matching torch semantics (Upsample->Conv->BN(eval)->ReLU)."""
    up = jnp.repeat(jnp.repeat(x, 2, axis=2), 2, axis=3)
    y = jax.lax.conv_general_dilated(
        up, w, window_strides=(1, 1), padding=((1, 1), (1, 1)),
        dimension_numbers=("NCHW", "OIHW", "NCHW"))
    y = y + b[None, :, None, None]
    y = (y - running_mean[None, :, None, None]) * jax.lax.rsqrt(
        running_var[None, :, None, None] + EPS) * gamma[None, :, None, None] \
        + beta[None, :, None, None]
    return jnp.maximum(y, 0.0)


if __name__ == "__main__":
    N, Cin, Cout, H, W = 2, 4, 8, 16, 16

    key = jax.random.PRNGKey(0)
    kx, kw, kb, kg, kbt, km, kv = jax.random.split(key, 7)
    x = jax.random.normal(kx, (N, Cin, H, W), jnp.float32)
    w = 0.1 * jax.random.normal(kw, (Cout, Cin, 3, 3), jnp.float32)
    b = 0.1 * jax.random.normal(kb, (Cout,), jnp.float32)
    gamma = 1.0 + 0.1 * jax.random.normal(kg, (Cout,), jnp.float32)
    beta = 0.1 * jax.random.normal(kbt, (Cout,), jnp.float32)
    running_mean = 0.1 * jax.random.normal(km, (Cout,), jnp.float32)
    running_var = 0.5 + jax.random.uniform(kv, (Cout,), jnp.float32)

    out = up_conv(x, w, b, gamma, beta, running_mean, running_var)
    out = jax.block_until_ready(out)

    ref = reference(x, w, b, gamma, beta, running_mean, running_var)
    assert out.shape == (N, Cout, 2 * H, 2 * W), out.shape
    # Tolerance accounts for bf16 MXU operands (f32 accumulation); fold/weights
    # are summed exactly in f32 before the bf16 cast.
    assert jnp.allclose(out, ref, rtol=3e-2, atol=3e-2), float(
        jnp.max(jnp.abs(out - ref)))

    print("KERNEL_OK")
</pallas_src>

<mosaic_0001>
module attributes {stable_mosaic.version = 11 : i64} {
  func.func @up_conv_kernel(%arg0: i32, %arg1: i32, %arg2: memref<1x17x128xbf16, #tpu.memory_space<vmem>>, %arg3: memref<1x128x256xbf16, #tpu.memory_space<vmem>>, %arg4: memref<2x256xf32, #tpu.memory_space<vmem>>, %arg5: memref<1x1x16x256xf32, #tpu.memory_space<vmem>>) attributes {dimension_semantics = [#tpu.dimension_semantics<parallel>, #tpu.dimension_semantics<arbitrary>], iteration_bounds = array<i64: 2, 2>, scalar_prefetch = 0 : i64, scratch_operands = 0 : i64, tpu.core_type = #tpu.core_type<tc>, window_params = [{transform_indices = @transform_0, window_bounds = array<i64: 1, 17, 128>}, {transform_indices = @transform_1, window_bounds = array<i64: 1, 128, 256>}, {pipeline_mode = #tpu.pipeline_mode<synchronous>, transform_indices = @transform_2, window_bounds = array<i64: 2, 256>}, {transform_indices = @transform_3, window_bounds = array<i64: 1, 1, 16, 256>}]} {
    %c1_i32 = arith.constant 1 : i32
    %0 = arith.cmpi eq, %arg1, %c1_i32 : i32
    %c0 = arith.constant 0 : index
    %c0_0 = arith.constant 0 : index
    %c0_1 = arith.constant 0 : index
    %1 = vector.load %arg2[%c0, %c0_0, %c0_1] : memref<1x17x128xbf16, #tpu.memory_space<vmem>>, vector<1x16x128xbf16>
    %2 = vector.shape_cast %1 : vector<1x16x128xbf16> to vector<16x128xbf16>
    %c0_2 = arith.constant 0 : index
    %c1 = arith.constant 1 : index
    %c0_3 = arith.constant 0 : index
    %3 = vector.load %arg2[%c0_2, %c1, %c0_3] : memref<1x17x128xbf16, #tpu.memory_space<vmem>>, vector<1x16x128xbf16>
    %4 = vector.shape_cast %3 : vector<1x16x128xbf16> to vector<16x128xbf16>
    %5 = arith.select %0, %4, %2 : vector<16x128xbf16>
    %c0_4 = arith.constant 0 : index
    %c0_5 = arith.constant 0 : index
    %c0_6 = arith.constant 0 : index
    %6 = vector.load %arg3[%c0_4, %c0_5, %c0_6] : memref<1x128x256xbf16, #tpu.memory_space<vmem>>, vector<1x128x256xbf16>
    %7 = vector.shape_cast %6 : vector<1x128x256xbf16> to vector<128x256xbf16>
    %cst = arith.constant dense<0.000000e+00> : vector<16x256xf32>
    %8 = tpu.matmul %5, %7, %cst {dimension_numbers = #tpu.dot_dimension_numbers<[1], [0], [0], [1], [0, 0, 1, 1], [], []>} : vector<16x128xbf16>, vector<128x256xbf16>, vector<16x256xf32> -> vector<16x256xf32>
    %c0_7 = arith.constant 0 : index
    %c0_8 = arith.constant 0 : index
    %9 = vector.load %arg4[%c0_7, %c0_8] : memref<2x256xf32, #tpu.memory_space<vmem>>, vector<1x256xf32>
    %c1_9 = arith.constant 1 : index
    %c0_10 = arith.constant 0 : index
    %10 = vector.load %arg4[%c1_9, %c0_10] : memref<2x256xf32, #tpu.memory_space<vmem>>, vector<1x256xf32>
    %11 = vector.broadcast %9 : vector<1x256xf32> to vector<16x256xf32>
    %12 = arith.mulf %8, %11 : vector<16x256xf32>
    %13 = vector.broadcast %10 : vector<1x256xf32> to vector<16x256xf32>
    %14 = arith.addf %12, %13 : vector<16x256xf32>
    %cst_11 = arith.constant 0.000000e+00 : f32
    %15 = vector.broadcast %cst_11 : f32 to vector<16x256xf32>
    %16 = arith.maximumf %14, %15 : vector<16x256xf32>
    %c0_12 = arith.constant 0 : index
    %c0_13 = arith.constant 0 : index
    %c0_14 = arith.constant 0 : index
    %c0_15 = arith.constant 0 : index
    %17 = vector.load %arg5[%c0_12, %c0_13, %c0_14, %c0_15] : memref<1x1x16x256xf32, #tpu.memory_space<vmem>>, vector<1x1x16x256xf32>
    %18 = vector.shape_cast %17 : vector<1x1x16x256xf32> to vector<16x256xf32>
    %19 = vector.shape_cast %16 : vector<16x256xf32> to vector<1x1x16x256xf32>
    tpu.vector_store %arg5[%c0_12, %c0_13, %c0_14, %c0_15], %19 {strides = array<i32>} : memref<1x1x16x256xf32, #tpu.memory_space<vmem>>, vector<1x1x16x256xf32>,
    return
  }
  func.func @transform_0(%arg0: i32, %arg1: i32) -> (i32, i32, i32) {
    %c0_i32 = arith.constant 0 : i32
    %c0_i32_0 = arith.constant 0 : i32
    %c0_i32_1 = arith.constant 0 : i32
    return %arg0, %c0_i32, %c0_i32_0 : i32, i32, i32
  }
  func.func @transform_1(%arg0: i32, %arg1: i32) -> (i32, i32, i32) {
    %c0_i32 = arith.constant 0 : i32
    %c0_i32_0 = arith.constant 0 : i32
    %c0_i32_1 = arith.constant 0 : i32
    return %arg1, %c0_i32, %c0_i32_0 : i32, i32, i32
  }
  func.func @transform_2(%arg0: i32, %arg1: i32) -> (i32, i32) {
    %c0_i32 = arith.constant 0 : i32
    %c0_i32_0 = arith.constant 0 : i32
    %c0_i32_1 = arith.constant 0 : i32
    return %c0_i32, %c0_i32_0 : i32, i32
  }
  func.func @transform_3(%arg0: i32, %arg1: i32) -> (i32, i32, i32, i32) {
    %c0_i32 = arith.constant 0 : i32
    %c0_i32_0 = arith.constant 0 : i32
    %c0_i32_1 = arith.constant 0 : i32
    return %arg0, %arg1, %c0_i32, %c0_i32_0 : i32, i32, i32, i32
  }
}

</mosaic_0001>

<bundles_post_ra>
// kernel: tile.17
= control target key start
LH: loop header
LB: loop body
LE: loop exit
PB: predicated region body
PF: predicated region fallthrough
CT: control target
= control target key end

     0   :  { %s40_s0 = inlined_call_operand.vmem [shape: f32[8], index: 0, kind: input, shape index: {}]   ;;  %s41_s1 = inlined_call_operand.vmem [shape: f32[32,8], index: 1, kind: output, shape index: {}]  }
   0x1   :  { %v4_v0 = vld [vmem:[%s40_s0] ss:$0 sm:$0xff] }
   0x2   :  { %5 = vst [vmem:[%s41_s1] sm:$0xff] %v4_v0 }
   0x3   :  { %12 = vst [vmem:[%s41_s1 + $0x8] sm:$0xff] %v4_v0 }
   0x4   :  { %13 = vst [vmem:[%s41_s1 + $0x10] sm:$0xff] %v4_v0 }
   0x5   :  { %14 = vst [vmem:[%s41_s1 + $0x18] sm:$0xff] %v4_v0 }

// kernel: tile.19
= control target key start
LH: loop header
LB: loop body
LE: loop exit
PB: predicated region body
PF: predicated region fallthrough
CT: control target
= control target key end

     0   :  { %s7_s6 = smov 3  ;;  %s21_s9 = smov 3  ;;  %vm4_vm0 = vcmask 64512   ;;  %vm11_vm1 = vcmask 1048512   ;;  %vm18_vm2 = vcmask 982912   ;;  %vm25_vm3 = vcmask 917312   ;;  %s233_s0 = inlined_call_operand.vmem [shape: f32[32,8], index: 0, kind: input, shape index: {}]   ;;  %s234_s1 = inlined_call_operand.vmem [shape: f32[1,256], index: 1, kind: output, shape index: {}]  }
   0x1   :  { %v123_v0 = vld [vmem:[%s233_s0 + $0xf] ss:$16 sm:%s7_s6]   ;;  %s154_s10 = smov 120   ;;  %v125_v1 = vld [vmem:[%s233_s0 + $0xd] ss:$16 sm:%s21_s9]   ;;  %s155_s13 = smov 104  }
   0x2   :  { %9 = vrot.lane.b32.xlu0 %v123_v0, %s154_s10  ;;  %23 = vrot.lane.b32.xlu1 %v125_v1, %s155_s13  ;;  %s14_s14 = smov 3  ;;  %s28_s15 = smov 3  ;;  %vm32_vm4 = vcmask 851712   ;;  %vm39_vm5 = vcmask 786112   ;;  %vm46_vm6 = vcmask 720512   ;;  %vm53_vm7 = vcmask 654912  }
   0x3   :  { %v124_v2 = vld [vmem:[%s233_s0 + $0xe] ss:$16 sm:%s14_s14]   ;;  %v126_v3 = vld [vmem:[%s233_s0 + $0xc] ss:$16 sm:%s28_s15]   ;;  %s35_s20 = smov 3  ;;  %s156_s23 = smov 112  }
   0x4   :  { %v127_v4 = vld [vmem:[%s233_s0 + $0xb] ss:$16 sm:%s35_s20]   ;;  %s157_s24 = smov 88   ;;  %s158_s25 = smov 96   ;;  %vm60_vm8 = vcmask 589312   ;;  %vm67_vm9 = vcmask 523712  }
   0x5   :  { %37 = vrot.lane.b32.xlu2 %v127_v4, %s157_s24  ;;  %s49_s26 = smov 3  ;;  %s42_s27 = smov 3  ;;  %vm74_vm10 = vcmask 458112   ;;  %vm81_vm11 = vcmask 392512   ;;  %vm88_vm12 = vcmask 326912   ;;  %vm95_vm13 = vcmask 261312  }
   0x6   :  { %s56_s28 = smov 3  ;;  %v129_v5 = vld [vmem:[%s233_s0 + $0x9] ss:$16 sm:%s49_s26]   ;;  %v128_v6 = vld [vmem:[%s233_s0 + $0xa] ss:$16 sm:%s42_s27]   ;;  %s159_s6 = smov 72  }
   0x7   :  { %v130_v7 = vld [vmem:[%s233_s0 + $0x8] ss:$16 sm:%s56_s28]   ;;  %s160_s7 = smov 80   ;;  %s161_s8 = smov 64   ;;  %vm102_vm14 = vcmask 195712   ;;  %vm109_vm15 = vcmask 130112  }
   0x8   :  { %s70_s9 = smov 3  ;;  %s63_s10 = smov 3 }
   0x9   :  { %s77_s11 = smov 3  ;;  %v132_v8 = vld [vmem:[%s233_s0 + $0x6] ss:$16 sm:%s70_s9]   ;;  %v131_v9 = vld [vmem:[%s233_s0 + $0x7] ss:$16 sm:%s63_s10]   ;;  %s162_s18 = smov 48  }
   0xa   :  { %16 = vrot.lane.b32.xlu0 %v124_v2, %s156_s23  ;;  %30 = vrot.lane.b32.xlu1 %v126_v3, %s158_s25  ;;  %v133_v10 = vld [vmem:[%s233_s0 + $0x5] ss:$16 sm:%s77_s11]   ;;  %s163_s19 = smov 56   ;;  %s164_s20 = smov 40  }
   0xb   :  { %s91_s21 = smov 3  ;;  %s84_s22 = smov 3 }
   0xc   :  { %s98_s23 = smov 3  ;;  %v135_v11 = vld [vmem:[%s233_s0 + $0x3] ss:$16 sm:%s91_s21]   ;;  %v134_v12 = vld [vmem:[%s233_s0 + $0x4] ss:$16 sm:%s84_s22]   ;;  %s165_s30 = smov 24  }
   0xd   :  { %44 = vrot.lane.b32.xlu2 %v128_v6, %s160_s7  ;;  %v136_v13 = vld [vmem:[%s233_s0 + $0x2] ss:$16 sm:%s98_s23]   ;;  %s166_s2 = smov 32   ;;  %s167_s3 = smov 16  }
   0xe   :  { %s105_s4 = smov 3  ;;  %s168_s7 = smov 8  }
   0xf   :  { %v137_v14 = vld [vmem:[%s233_s0 + $0x1] ss:$16 sm:%s105_s4]  }
  0x12   :  { %51 = vrot.lane.b32.xlu0 %v129_v5, %s159_s6  ;;  %58 = vrot.lane.b32.xlu1 %v130_v7, %s161_s8  ;;  %s2_s8 = smov 3 }
  0x13   :  { %v3_v15 = vld [vmem:[%s233_s0] ss:$16 sm:%s2_s8]  }
  0x14   :  { %5 = vst.msk [vmem:[#allocation0] ss:$8 sm:$0x3] %vm4_vm0, %v3_v15  }
  0x15   :  { %65 = vrot.lane.b32.xlu2 %v131_v9, %s163_s19 }
  0x1a   :  { %72 = vrot.lane.b32.xlu0 %v132_v8, %s162_s18  ;;  %79 = vrot.lane.b32.xlu1 %v133_v10, %s164_s20 }
  0x1d   :  { %86 = vrot.lane.b32.xlu2 %v134_v12, %s166_s2 }
  0x22   :  { %93 = vrot.lane.b32.xlu0 %v135_v11, %s165_s30  ;;  %100 = vrot.lane.b32.xlu1 %v136_v13, %s167_s3 }
  0x25   :  { %107 = vrot.lane.b32.xlu2 %v137_v14, %s168_s7 }
  0x5f   :  { %v38_v16 = vpop.permute.xlu2 %37  }
  0x67   :  { %v45_v17 = vpop.permute.xlu2 %44  }
  0x6f   :  { %v66_v19 = vpop.permute.xlu2 %65  }
  0x74   :  { %v10_v18 = vpop.permute.xlu0 %9   ;;  %v24_v20 = vpop.permute.xlu1 %23  }
  0x75   :  { %12 = vst.msk [vmem:[#allocation0] ss:$8 sm:$0x3] %vm11_vm1, %v10_v18  }
  0x77   :  { %v87_v22 = vpop.permute.xlu2 %86  }
  0x7c   :  { %v17_v21 = vpop.permute.xlu0 %16   ;;  %v31_v23 = vpop.permute.xlu1 %30  }
  0x7d   :  { %19 = vst.msk [vmem:[#allocation0] ss:$8 sm:$0x3] %vm18_vm2, %v17_v21  }
  0x7e   :  { %26 = vst.msk [vmem:[#allocation0] ss:$8 sm:$0x3] %vm25_vm3, %v24_v20  }
  0x7f   :  { %33 = vst.msk [vmem:[#allocation0] ss:$8 sm:$0x3] %vm32_vm4, %v31_v23   ;;  %v108_v25 = vpop.permute.xlu2 %107  }
  0x80   :  { %40 = vst.msk [vmem:[#allocation0] ss:$8 sm:$0x3] %vm39_vm5, %v38_v16  }
  0x81   :  { %47 = vst.msk [vmem:[#allocation0] ss:$8 sm:$0x3] %vm46_vm6, %v45_v17  }
  0x84   :  { %v52_v24 = vpop.permute.xlu0 %51   ;;  %v59_v26 = vpop.permute.xlu1 %58  }
  0x85   :  { %54 = vst.msk [vmem:[#allocation0] ss:$8 sm:$0x3] %vm53_vm7, %v52_v24  }
  0x86   :  { %61 = vst.msk [vmem:[#allocation0] ss:$8 sm:$0x3] %vm60_vm8, %v59_v26  }
  0x87   :  { %68 = vst.msk [vmem:[#allocation0] ss:$8 sm:$0x3] %vm67_vm9, %v66_v19  }
  0x8c   :  { %v73_v27 = vpop.permute.xlu0 %72   ;;  %v80_v28 = vpop.permute.xlu1 %79  }
  0x8d   :  { %75 = vst.msk [vmem:[#allocation0] ss:$8 sm:$0x3] %vm74_vm10, %v73_v27  }
  0x8e   :  { %82 = vst.msk [vmem:[#allocation0] ss:$8 sm:$0x3] %vm81_vm11, %v80_v28  }
  0x8f   :  { %89 = vst.msk [vmem:[#allocation0] ss:$8 sm:$0x3] %vm88_vm12, %v87_v22  }
  0x94   :  { %v94_v29 = vpop.permute.xlu0 %93   ;;  %v101_v30 = vpop.permute.xlu1 %100  }
  0x95   :  { %96 = vst.msk [vmem:[#allocation0] ss:$8 sm:$0x3] %vm95_vm13, %v94_v29  }
  0x96   :  { %103 = vst.msk [vmem:[#allocation0] ss:$8 sm:$0x3] %vm102_vm14, %v101_v30  }
  0x97   :  { %110 = vst.msk [vmem:[#allocation0] ss:$8 sm:$0x3] %vm109_vm15, %v108_v25  }
  0x9e   :  { %v113_v31 = vld [vmem:[#allocation0] sm:$0x1]  ;;  %v118_v32 = vld [vmem:[#allocation0 + $0x8] sm:$0x1] }
  0x9f   :  { %116 = vst [vmem:[%s234_s1] sm:$0x1] %v113_v31 }
  0xa0   :  { %138 = vst [vmem:[%s234_s1 + $0x1] sm:$0x1] %v118_v32 }

// kernel: up_conv.1
= control target key start
LH: loop header
LB: loop body
LE: loop exit
PB: predicated region body
PF: predicated region fallthrough
CT: control target
= control target key end

     0   :  { %s715_s12 = smov 0   ;;  %s717_s13 = smov 0   ;;  %s844_s0 = inlined_call_operand.vmem [shape: bf16[2,17,128], index: 0, kind: input, shape index: {}]   ;;  %s845_s1 = inlined_call_operand.vmem [shape: bf16[2,128,256], index: 1, kind: input, shape index: {}]   ;;  %s846_s2 = inlined_call_operand.vmem [shape: f32[2,256], index: 2, kind: input, shape index: {}]   ;;  %s847_s3 = inlined_call_operand.vmem [shape: f32[2,2,16,256], index: 3, kind: output, shape index: {}]  }
   0x1   :  { %s719_s14 = smov 0   ;;  %s721_s15 = smov 0  }
   0x2   :  { %s723_s16 = smov 0  }
   0x3 LB: > { %s22_s17 = sadd.s32 1, %s685_s14  ;;  %s25_s18 = sadd.s32 1, %s689_s15  ;;  %s693_s16 = sphi %s723_s16, %s13_s16   ;;  %s689_s15 = sphi %s721_s15, %s853_s15   ;;  %s685_s14 = sphi %s719_s14, %s852_s14   ;;  %s681_s13 = sphi %s717_s13, %s851_s13   ;;  %s677_s12 = sphi %s715_s12, %s850_s12  }
   0x4   : > { %p23_p0 = scmp.ge.s32.totalorder %s22_s17, 2  ;;  %p523_p1 = scmp.ge.s32.totalorder %s693_s16, 1 }
   0x5   : > { %p161_p2 = scmp.lt.s32.totalorder %s693_s16, 5 }
   0x6   : > { %s855_s17 = smov (%p23_p0, %s22_s17), 0  ;;  %s857_s18 = smov (!%p23_p0, %s25_s18), %s689_s15 }
   0x7   : > { %p162_p3 = pnand %p523_p1, %p161_p2  ;;  %p27_p4 = scmp.ge.s32.totalorder %s857_s18, 2 }
   0x8   : > { %p199_p5 = scmp.lt.s32.totalorder (!%p162_p3), %s677_s12, 1  ;;  %p194_p6 = scmp.lt.s32.totalorder (!%p162_p3), %s681_s13, 1 }
   0x9   : > { %s859_s18 = smov (%p27_p4, %s857_s18), 0  ;;  %165 = sbr.rel (%p162_p3) target bundleno = 194 (0xc2), region = 32 }
   0xa   : > { %p213_p7 = scmp.eq.s32.totalorder (!%p162_p3), %s677_s12, 1 }
   0xe   : > { %s749_s19 = scalar_select %p199_p5, %s677_s12, 1  ;;  %vm220_vm0 = vsmask.f32 256  ;;  %vm221_vm1 = vsmask.f32 4368 }
   0xf   : > { %s861_s13 = smov (!%p194_p6, %s681_s13), 1  ;;  %vm222_vm3 = vmor %vm220_vm0, %vm221_vm1  ;;  %vm270_vm4 = vsmask.f32 7424 }
  0x10   : > { %s597_s20 = sshll.u32 %s749_s19, 7  ;;  %s614_s24 = smul.u32 12, %s861_s13 }
  0x11   : > { %s757_s23 = scalar_lea.vmem %s845_s1, %s597_s20  ;;  %s527_s28 = sshll.u32 %s749_s19, 2 }
  0x12   : > { %v588_v0 = vld [vmem:[%s757_s23 + $0x70] sm:$0xf]  ;;  %v613_v1 = vld [vmem:[%s757_s23 + $0x74] sm:$0xf0]  ;;  %v612_v2 = vld [vmem:[%s757_s23 + $0x74] sm:$0xf]  ;;  %s776_s27 = scalar_lea.vmem %s844_s0, %s614_s24 }
  0x13   : > { %v589_v3 = vor.u32 %v613_v1, %v588_v0  ;;  %v590_v4 = vld [vmem:[%s757_s23 + $0x78] sm:$0xf0]  ;;  %v580_v5 = vld [vmem:[%s757_s23 + $0x60] sm:$0xf]  ;;  %v611_v6 = vld [vmem:[%s757_s23 + $0x64] sm:$0xf0] }
  0x14   : > { %v593_v7 = vor.u32 %v612_v2, %v590_v4  ;;  %v610_v8 = vld [vmem:[%s757_s23 + $0x64] sm:$0xf]  ;;  %v582_v9 = vld [vmem:[%s757_s23 + $0x68] sm:$0xf0]  ;;  %v581_v10 = vor.u32 %v611_v6, %v580_v5  ;;  %v572_v12 = vld [vmem:[%s757_s23 + $0x50] sm:$0xf] }
  0x15   : > { %364 = vmatpush.bf16.msra.mxu0 %v589_v3  ;;  %v585_v11 = vor.u32 %v610_v8, %v582_v9  ;;  %v609_v13 = vld [vmem:[%s757_s23 + $0x54] sm:$0xf0]  ;;  %v608_v14 = vld [vmem:[%s757_s23 + $0x54] sm:$0xf]  ;;  %v574_v15 = vld [vmem:[%s757_s23 + $0x58] sm:$0xf0] }
  0x16   : > { %378 = vmatpush.bf16.msra.mxu1 %v593_v7  ;;  %v573_v16 = vor.u32 %v609_v13, %v572_v12  ;;  %v564_v17 = vld [vmem:[%s757_s23 + $0x40] sm:$0xf]  ;;  %v577_v18 = vor.u32 %v608_v14, %v574_v15  ;;  %v607_v19 = vld [vmem:[%s757_s23 + $0x44] sm:$0xf0]  ;;  %v606_v20 = vld [vmem:[%s757_s23 + $0x44] sm:$0xf] }
  0x17   : > { %v566_v21 = vld [vmem:[%s757_s23 + $0x48] sm:$0xf0]  ;;  %v556_v22 = vld [vmem:[%s757_s23 + $0x30] sm:$0xf]  ;;  %v605_v23 = vld [vmem:[%s757_s23 + $0x34] sm:$0xf0]  ;;  %v565_v26 = vor.u32 %v607_v19, %v564_v17 }
  0x18   : > { %v604_v24 = vld [vmem:[%s757_s23 + $0x34] sm:$0xf]  ;;  %v214_v25 = vld [vmem:[%s776_s27] sm:$0xf]  ;;  %v569_v27 = vor.u32 %v606_v20, %v566_v21  ;;  %v558_v28 = vld [vmem:[%s757_s23 + $0x38] sm:$0xf0]  ;;  %v557_v37 = vor.u32 %v605_v23, %v556_v22 }
  0x19   : > { %365 = vmatpush.bf16.msra.mxu0 %v581_v10  ;;  %v215_v29 = vld [vmem:[%s776_s27 + $0x4] sm:$0xf]  ;;  %s217_s29 = scalar_select %p213_p7, 1, 0  ;;  %v224_v30 = vshrl.u32 %v214_v25, 16  ;;  %v227_v31 = vshll.u32 %v214_v25, 16  ;;  %v561_v38 = vor.u32 %v604_v24, %v558_v28 }
  0x1a   : > { %379 = vmatpush.bf16.msra.mxu1 %v585_v11  ;;  %v232_v32 = vshrl.u32 %v215_v29, 16  ;;  %v235_v33 = vshll.u32 %v215_v29, 16  ;;  %s528_s30 = sshll.u32 %s861_s13, 3  ;;  %v216_v39 = vld [vmem:[%s776_s27 + $0x8] sm:$0x1] }
  0x1b   : > { %v218_v34 = vstv %s217_s29  ;;  %s792_s4 = sadd.s32 %s528_s30, %s527_s28  ;;  %v226_v35 = vrot.slane %v224_v30, 7  ;;  %v548_v41 = vld [vmem:[%s757_s23 + $0x20] sm:$0xf]  ;;  %v603_v42 = vld [vmem:[%s757_s23 + $0x24] sm:$0xf0] }
  0x1c   : > { %v234_v36 = vrot.slane %v232_v32, 7  ;;  %vm795_vm2 = vcmp.eq.s32.totalorder %v218_v34, 1  ;;  %v602_v47 = vld [vmem:[%s757_s23 + $0x24] sm:$0xf]  ;;  %v550_v48 = vld [vmem:[%s757_s23 + $0x28] sm:$0xf0]  ;;  %v549_v52 = vor.u32 %v603_v42, %v548_v41 }
  0x1d   : > { %366 = vmatpush.bf16.msra.mxu0 %v573_v16  ;;  %v229_v43 = vor.u32 %v227_v31, %v226_v35  ;;  %v230_v44 = vrot.slane %v226_v35, 4  ;;  %v553_v56 = vor.u32 %v602_v47, %v550_v48  ;;  %v540_v57 = vld [vmem:[%s757_s23 + $0x10] sm:$0xf]  ;;  %v601_v58 = vld [vmem:[%s757_s23 + $0x14] sm:$0xf0]  ;;  %s529_s9 = sshll.u32 %s792_s4, 3 }
  0x1e   : > { %380 = vmatpush.bf16.msra.mxu1 %v577_v18  ;;  %v237_v45 = vor.u32 %v235_v33, %v234_v36  ;;  %v239_v46 = vrot.slane %v234_v36, 4  ;;  %v600_v60 = vld [vmem:[%s757_s23 + $0x14] sm:$0xf]  ;;  %v542_v61 = vld [vmem:[%s757_s23 + $0x18] sm:$0xf0]  ;;  %v541_v0 = vor.u32 %v601_v58, %v540_v57  ;;  %s212_s12 = scalar_lea.vmem %s847_s3, %s529_s9 }
  0x1f   : > { %v243_v50 = vsel %vm795_vm2, %v214_v25, %v229_v43  ;;  %v545_v2 = vor.u32 %v600_v60, %v542_v61  ;;  %v532_v3 = vld [vmem:[%s757_s23] sm:$0xf]  ;;  %v599_v4 = vld [vmem:[%s757_s23 + $0x4] sm:$0xf0]  ;;  %v598_v7 = vld [vmem:[%s757_s23 + $0x4] sm:$0xf] }
  0x20   : > { %v238_v49 = vsel %vm222_vm3, %v230_v44, %v237_v45  ;;  %v245_v51 = vsel %vm795_vm2, %v216_v39, %v239_v46  ;;  %v265_v54 = vunpack.c.l.b16 %v243_v50  ;;  %v534_v8 = vld [vmem:[%s757_s23 + $0x8] sm:$0xf0]  ;;  %v533_v10 = vor.u32 %v599_v4, %v532_v3  ;;  %v392_v15 = vld [vmem:[%s846_s2] ss:$2 sm:$0x3] }
  0x21   : > { %367 = vmatpush.bf16.msra.mxu0 %v565_v26  ;;  %v244_v53 = vsel %vm795_vm2, %v215_v29, %v238_v49  ;;  %v267_v55 = vunpack.c.l.b16 %v245_v51  ;;  %v537_v12 = vor.u32 %v598_v7, %v534_v8  ;;  %v594_v16 = vld [vmem:[%s846_s2 + $0x1] ss:$2 sm:$0x3]  ;;  %v396_v17 = vperm.slane %v392_v15, 0 }
  0x22   : > { %381 = vmatpush.bf16.msra.mxu1 %v569_v27  ;;  %v266_v59 = vunpack.c.l.b16 %v244_v53  ;;  %v397_v18 = vperm.slane %v392_v15, 1  ;;  %v405_v19 = vperm.slane %v594_v16, 0  ;;  %v406_v21 = vperm.slane %v594_v16, 1 }
  0x23   : > { %v269_v62 = vpack.c.b16 %v267_v55, %v267_v55 }
  0x24   : > { %v268_v63 = vpack.c.b16 %v266_v59, %v265_v54 }
  0x25   : > { %368 = vmatpush.bf16.msra.mxu0 %v557_v37  ;;  %v279_v1 = vshll.u32 %v269_v62, 16 }
  0x26   : > { %382 = vmatpush.bf16.msra.mxu1 %v561_v38  ;;  %v272_v5 = vshrl.u32 %v268_v63, 16  ;;  %v274_v6 = vshll.u32 %v268_v63, 16 }
  0x27   : > { %v281_v11 = vrot.slane %v279_v1, 1 }
  0x28   : > { %v276_v9 = vrot.slane %v274_v6, 1 }
  0x29   : > { %369 = vmatpush.bf16.msra.mxu0 %v549_v52 }
  0x2a   : > { %383 = vmatpush.bf16.msra.mxu1 %v553_v56  ;;  %v277_v13 = vor.u32 %v276_v9, %v272_v5 }
  0x2c   : > { %v282_v14 = vsel %vm270_vm4, %v277_v13, %v281_v11 }
  0x2d   : > { %370 = vmatpush.bf16.msra.mxu0 %v541_v0 }
  0x2e   : > { %384 = vmatpush.bf16.msra.mxu1 %v545_v2 }
  0x31   : > { %371 = vmatpush.bf16.msra.mxu0 %v533_v10 }
  0x32   : > { %385 = vmatpush.bf16.msra.mxu1 %v537_v12 }
  0x34   : > { %372 = vmatmul.bf16.vlgmr.msra.gmra.mxu0 %v282_v14 }
  0x35   : > { %386 = vmatmul.bf16.vlgmr.msra.gmra.mxu1 %v282_v14 }
  0xb1   : > { %v373_v20 = vpop.f32.mrf.mxu0 }
  0xb2   : > { %v400_v22 = vmul.f32 %v396_v17, %v373_v20  ;;  %v387_v23 = vpop.f32.mrf.mxu1 }
  0xb3   : > { %v401_v24 = vmul.f32 %v397_v18, %v387_v23 }
  0xb4   : > { %v409_v25 = vadd.f32 %v405_v19, %v400_v22 }
  0xb5   : > { %v410_v26 = vadd.f32 %v406_v21, %v401_v24 }
  0xb6   : > { %v413_v27 = vmax.f32 %v409_v25, 0.0 }
  0xb7   : > { %v414_v28 = vmax.f32 %v410_v26, 0.0 }
  0xb8   : > { %417 = vst [vmem:[%s212_s12] sm:$0xff] %v413_v27 }
  0xb9   : > { %418 = vst [vmem:[%s212_s12 + $0x8] sm:$0xff] %v414_v28  ;;  %v375_v29 = vpop.f32.mrf.mxu0 }
  0xba   : > { %v402_v30 = vmul.f32 %v396_v17, %v375_v29  ;;  %v389_v31 = vpop.f32.mrf.mxu1 }
  0xbb   : > { %v403_v32 = vmul.f32 %v397_v18, %v389_v31 }
  0xbc   : > { %v411_v33 = vadd.f32 %v405_v19, %v402_v30 }
  0xbd   : > { %v412_v34 = vadd.f32 %v406_v21, %v403_v32 }
  0xbe   : > { %v415_v35 = vmax.f32 %v411_v33, 0.0 }
  0xbf   : > { %v416_v36 = vmax.f32 %v412_v34, 0.0 }
  0xc0   : > { %419 = vst [vmem:[%s212_s12 + $0x10] sm:$0xff] %v415_v35 }
  0xc1   : > { %420 = vst [vmem:[%s212_s12 + $0x18] sm:$0xff] %v416_v36 }
  0xc2 PF: > { %s13_s16 = sadd.s32 1, %s693_s16   ;;  %s850_s12 = smov %s685_s14 }
  0xc3   : > { %p10_p8 = scmp.ge.s32.totalorder %s13_s16, 6   ;;  %s851_s13 = smov %s689_s15 }
  0xc4   : > { %s852_s14 = smov %s855_s17  ;;  %s853_s15 = smov %s859_s18 }
  0xc5   :  { %12 = sbr.rel (!%p10_p8) target bundleno = 3 (0x3), region = 66 }

</bundles_post_ra>
